<compile_context>
chip_gen: v7x
topology: tpu7x:2x2x1
jax: 0.10.0
libtpu: 0.0.40
codegen_flags: <defaults>
</compile_context>

<pallas_src>
import functools

import jax
import jax.numpy as jnp
from jax import lax
from jax.experimental import pallas as pl
from jax.experimental.pallas import tpu as pltpu


_LANE = 128
_TARGET_TILE_BYTES = 4 * 1024 * 1024      # ~4 MiB per (C, tk) feature tile


def _round_up(x, m):
    return ((x + m - 1) // m) * m


def _device_kind():
    try:
        return jax.devices()[0].device_kind.lower()
    except Exception:
        return ""


def _default_num_cores():
    # v7x has 2 TensorCores per chip; v5e / v6e have 1.
    return 2 if "v7" in _device_kind() else 1


def _default_vmem_limit():
    # v7x: 64 MiB physical VMEM per TC -> keep the scoped limit at 48 MiB.
    # v5e / v6e: 128 MiB physical -> 64 MiB scoped limit is safe and roomy.
    return (48 if "v7" in _device_kind() else 64) * 1024 * 1024


def _choose_tiling(c, hw, itemsize, num_cores, vmem_limit, tile_lanes=None):
    """Pick (tk, p, k_steps, nk_total) for the (C, H*W) feature slab."""
    if tile_lanes is not None:
        tk = max(_LANE, _round_up(int(tile_lanes), _LANE))
    else:
        # Bytes-based tile: ~4 MiB per (C, tk) block, at least 512 lanes,
        # capped so the double-buffered input stays well inside the VMEM limit.
        target_tk = (_TARGET_TILE_BYTES // (c * itemsize)) // _LANE * _LANE
        cap_tk = (int(vmem_limit * 0.5) // (2 * c * itemsize)) // _LANE * _LANE
        tk = max(4 * _LANE, min(target_tk, cap_tk))
        tk = max(tk, _LANE)
    if hw <= tk:
        # Whole reduction axis fits in one block: use the exact extent so the
        # block equals the full array dim (legal for any hw, no masking).
        return hw, 1, 1, 1
    nk_total = pl.cdiv(hw, tk)
    p = num_cores if (num_cores > 1 and nk_total >= num_cores) else 1
    k_steps = pl.cdiv(nk_total, p)
    return tk, p, k_steps, nk_total


def _feature_to_2d(feature_nchw):
    n, c, h, w = feature_nchw.shape
    assert n == 1, "StyleLoss gram assumes batch size 1 (matches .view(c, h*w))"
    return feature_nchw.reshape(c, h * w), c, h * w


def _gram_dot(a, b):
    # F contracted with itself over the lane axis -> (C, C); f32 accumulation.
    return lax.dot_general(a, b,
                           dimension_numbers=(((1,), (1,)), ((), ())),
                           preferred_element_type=jnp.float32)


# ----------------------- fused gram + loss kernel (p == 1) -------------------
def _gram_loss_kernel(f_ref, sg_ref, o_ref, acc_ref, *,
                      inv_norm, weight, hw, tk, nk_total, ragged):
    ki = pl.program_id(0)

    @pl.when(ki == 0)
    def _():
        acc_ref[...] = jnp.zeros_like(acc_ref)

    f = f_ref[...]
    if ragged:
        @pl.when(ki == nk_total - 1)
        def _():
            lane = lax.broadcasted_iota(jnp.int32, (1, tk), 1)
            mask = (ki * tk + lane) < hw
            fm = jnp.where(mask, f, jnp.zeros_like(f))
            acc_ref[...] += _gram_dot(fm, fm)

        @pl.when(ki < nk_total - 1)
        def _():
            acc_ref[...] += _gram_dot(f, f)
    else:
        acc_ref[...] += _gram_dot(f, f)

    @pl.when(ki == nk_total - 1)
    def _():
        gram = acc_ref[...] * inv_norm
        d = gram - sg_ref[...]
        o_ref[0, 0] = weight * jnp.sum(d * d)


def _fused_loss_call(f2d, style_gram, c, hw, *, weight, inv_norm,
                     tile_lanes=None, vmem_limit=None):
    vmem_limit = _default_vmem_limit() if vmem_limit is None else vmem_limit
    tk, _, _, nk_total = _choose_tiling(c, hw, f2d.dtype.itemsize, 1,
                                        vmem_limit, tile_lanes)
    ragged = (hw % tk) != 0
    kernel = functools.partial(_gram_loss_kernel,
                               inv_norm=float(inv_norm), weight=float(weight),
                               hw=hw, tk=tk, nk_total=nk_total, ragged=ragged)
    cost = pl.CostEstimate(flops=2 * c * c * hw + 3 * c * c,
                           transcendentals=0,
                           bytes_accessed=c * hw * f2d.dtype.itemsize
                                          + c * c * 4 + 4)
    return pl.pallas_call(
        kernel,
        out_shape=jax.ShapeDtypeStruct((1, 1), jnp.float32),
        grid_spec=pltpu.PrefetchScalarGridSpec(
            num_scalar_prefetch=0,
            grid=(nk_total,),
            in_specs=[pl.BlockSpec((c, tk), lambda ki: (0, ki)),
                      pl.BlockSpec((c, c), lambda ki: (0, 0))],
            out_specs=pl.BlockSpec((1, 1), lambda ki: (0, 0)),
            scratch_shapes=[pltpu.VMEM((c, c), jnp.float32)],
        ),
        compiler_params=pltpu.CompilerParams(
            dimension_semantics=("arbitrary",),
            vmem_limit_bytes=vmem_limit),
        cost_estimate=cost,
    )(f2d, style_gram)


# ------------------------- partial Gram kernel (p >= 1) ----------------------
def _partial_gram_kernel(f_ref, pg_ref, *, inv_norm, hw, tk, k_steps,
                         nk_total, ragged):
    pi = pl.program_id(0)
    ki = pl.program_id(1)
    blk = pi * k_steps + ki                       # logical block (may overflow)

    @pl.when(ki == 0)
    def _():
        pg_ref[...] = jnp.zeros_like(pg_ref)

    f = f_ref[...]
    if ragged:
        @pl.when(blk >= nk_total - 1)
        def _():
            lane = lax.broadcasted_iota(jnp.int32, (1, tk), 1)
            mask = (blk * tk + lane) < hw          # all-False for overflow blocks
            fm = jnp.where(mask, f, jnp.zeros_like(f))
            pg_ref[...] = pg_ref[...] + _gram_dot(fm, fm)

        @pl.when(blk < nk_total - 1)
        def _():
            pg_ref[...] = pg_ref[...] + _gram_dot(f, f)
    else:
        pg_ref[...] = pg_ref[...] + _gram_dot(f, f)

    @pl.when(ki == k_steps - 1)
    def _():
        pg_ref[...] = pg_ref[...] * inv_norm


def _partial_grams(f2d, c, hw, *, inv_norm, num_cores=None, tile_lanes=None,
                   vmem_limit=None):
    """Per-core partial Gram matrices, already normalized by 1/(c*h*w).

    Returns a (P, C, C) float32 array; summing over axis 0 gives the Gram.
    """
    num_cores = _default_num_cores() if num_cores is None else num_cores
    vmem_limit = _default_vmem_limit() if vmem_limit is None else vmem_limit
    tk, p, k_steps, nk_total = _choose_tiling(c, hw, f2d.dtype.itemsize,
                                              num_cores, vmem_limit, tile_lanes)
    ragged = (hw % tk != 0) or (p * k_steps != nk_total)

    def f_index(pi, ki):
        blk = pi * k_steps + ki
        if p * k_steps != nk_total:
            # Grid-rounding overflow blocks: clamp to a valid block; the kernel
            # masks their contribution to exactly zero.
            blk = jnp.minimum(blk, nk_total - 1)
        return (0, blk)

    kernel = functools.partial(_partial_gram_kernel,
                               inv_norm=float(inv_norm), hw=hw, tk=tk,
                               k_steps=k_steps, nk_total=nk_total,
                               ragged=ragged)
    cost = pl.CostEstimate(flops=2 * c * c * hw,
                           transcendentals=0,
                           bytes_accessed=c * hw * f2d.dtype.itemsize
                                          + p * c * c * 4)
    return pl.pallas_call(
        kernel,
        out_shape=jax.ShapeDtypeStruct((p, c, c), jnp.float32),
        grid_spec=pltpu.PrefetchScalarGridSpec(
            num_scalar_prefetch=0,
            grid=(p, k_steps),
            in_specs=[pl.BlockSpec((c, tk), f_index)],
            out_specs=pl.BlockSpec((None, c, c), lambda pi, ki: (pi, 0, 0)),
        ),
        compiler_params=pltpu.CompilerParams(
            dimension_semantics=("parallel", "arbitrary"),
            vmem_limit_bytes=vmem_limit),
        cost_estimate=cost,
    )(f2d)


# --------------------- combine (weighted SSE) kernel for p > 1 ---------------
def _combine_loss_kernel(pg_ref, sg_ref, o_ref, *, weight):
    gram = jnp.sum(pg_ref[...], axis=0)                       # (C, C)
    d = gram - sg_ref[...]
    o_ref[0, 0] = weight * jnp.sum(d * d)


def _combine_loss_call(partials, style_gram, weight, vmem_limit):
    p, c, _ = partials.shape
    kernel = functools.partial(_combine_loss_kernel, weight=float(weight))
    return pl.pallas_call(
        kernel,
        out_shape=jax.ShapeDtypeStruct((1, 1), jnp.float32),
        grid_spec=pltpu.PrefetchScalarGridSpec(
            num_scalar_prefetch=0,
            grid=(1,),
            in_specs=[pl.BlockSpec((p, c, c), lambda i: (0, 0, 0)),
                      pl.BlockSpec((c, c), lambda i: (0, 0))],
            out_specs=pl.BlockSpec((1, 1), lambda i: (0, 0)),
        ),
        compiler_params=pltpu.CompilerParams(
            dimension_semantics=("arbitrary",),
            vmem_limit_bytes=vmem_limit),
    )(partials, style_gram)


# ------------------------------ public wrappers -------------------------------
def gram_matrix(feature_nchw, *, num_cores=None, tile_lanes=None):
    """gram = (F @ F^T) / (c*h*w) where F = feature.view(c, h*w)."""
    f, c, hw = _feature_to_2d(feature_nchw)
    partials = _partial_grams(f, c, hw, inv_norm=1.0 / float(c * hw),
                              num_cores=num_cores, tile_lanes=tile_lanes)
    if partials.shape[0] == 1:
        return partials[0]
    return jnp.sum(partials, axis=0)              # tiny (P,C,C) -> (C,C) combine


def style_layer_loss(out_feature_nchw, style_gram, weight, *,
                     num_cores=None, tile_lanes=None):
    """weight * sum((gram(out_feature) - style_gram)**2) as a (1,1) array."""
    f, c, hw = _feature_to_2d(out_feature_nchw)
    inv_norm = 1.0 / float(c * hw)
    num_cores = _default_num_cores() if num_cores is None else num_cores
    vmem_limit = _default_vmem_limit()
    _, p, _, _ = _choose_tiling(c, hw, f.dtype.itemsize, num_cores,
                                vmem_limit, tile_lanes)
    if p == 1:
        # Single TensorCore (v5e / v6e): fuse the finalize into the gram kernel.
        return _fused_loss_call(f, style_gram, c, hw, weight=weight,
                                inv_norm=inv_norm, tile_lanes=tile_lanes,
                                vmem_limit=vmem_limit)
    # v7x (2 TensorCores): per-core partial grams + tiny combine kernel.
    partials = _partial_grams(f, c, hw, inv_norm=inv_norm, num_cores=num_cores,
                              tile_lanes=tile_lanes, vmem_limit=vmem_limit)
    return _combine_loss_call(partials, style_gram, weight, vmem_limit)


# ------------------------------ Module port -----------------------------------
class StyleLoss:
    """JAX/Pallas port of the PyTorch StyleLoss module (forward pass)."""

    def __init__(self, style_features, style_weights):
        self.style_weights = style_weights
        # Precompute style grams (detached constants) with the Pallas gram kernel.
        self.style_grams = {name: gram_matrix(feat)
                            for name, feat in style_features.items()}

    def __call__(self, output_features):
        style_err = jnp.zeros((), jnp.float32)
        for name, feat in output_features.items():
            layer = style_layer_loss(
                feat, self.style_grams[name], self.style_weights[name])
            style_err = style_err + layer[0, 0]
        return style_err


# ------------------------------ Reference --------------------------------------
def _ref_gram(feature_nchw):
    _, c, h, w = feature_nchw.shape
    f = feature_nchw.reshape(c, h * w).astype(jnp.float32)
    g = jnp.dot(f, f.T, precision=jax.lax.Precision.HIGHEST)
    return g / float(c * h * w)


def _ref_style_loss(style_features, output_features, style_weights):
    err = jnp.zeros((), jnp.float32)
    for name, feat in output_features.items():
        g_out = _ref_gram(feat)
        g_sty = _ref_gram(style_features[name])
        err = err + style_weights[name] * jnp.sum((g_out - g_sty) ** 2)
    return err


if __name__ == "__main__":
    key = jax.random.PRNGKey(0)
    keys = jax.random.split(key, 8)

    # Small VGG-ish feature maps: dict of NCHW tensors (N=1).
    style_features = {
        "conv1_1": jax.random.normal(keys[0], (1, 8, 16, 16), jnp.float32),
        "conv2_1": jax.random.normal(keys[1], (1, 16, 8, 8), jnp.float32),
        "conv3_1": jax.random.normal(keys[2], (1, 8, 96, 96), jnp.float32),
    }
    output_features = {
        "conv1_1": jax.random.normal(keys[3], (1, 8, 16, 16), jnp.float32),
        "conv2_1": jax.random.normal(keys[4], (1, 16, 8, 8), jnp.float32),
        "conv3_1": jax.random.normal(keys[5], (1, 8, 96, 96), jnp.float32),
    }
    style_weights = {"conv1_1": 0.5, "conv2_1": 1.5, "conv3_1": 0.75}

    loss_mod = StyleLoss(style_features, style_weights)
    loss = jax.block_until_ready(loss_mod(output_features))
    ref = jax.block_until_ready(
        _ref_style_loss(style_features, output_features, style_weights))
    assert jnp.allclose(loss, ref, rtol=1e-3, atol=1e-6), (loss, ref)

    # Exercise the multi-step reduction with a ragged (non-128-multiple) tail
    # and the forced 2-way core split + combine path.  On a single-TC chip the
    # "parallel" axis is just a serial loop, so these run correctly anywhere.
    ragged_style = jax.random.normal(keys[6], (1, 16, 17, 19), jnp.float32)  # hw=323
    ragged_out = jax.random.normal(keys[7], (1, 16, 17, 19), jnp.float32)

    g = jax.block_until_ready(
        gram_matrix(ragged_out, num_cores=2, tile_lanes=128))
    assert jnp.allclose(g, _ref_gram(ragged_out), rtol=1e-3, atol=1e-5)

    sg = gram_matrix(ragged_style)
    l_ref = 1.25 * jnp.sum((_ref_gram(ragged_out) - _ref_gram(ragged_style)) ** 2)
    l_two = jax.block_until_ready(
        style_layer_loss(ragged_out, sg, 1.25, num_cores=2, tile_lanes=128))
    l_one = jax.block_until_ready(
        style_layer_loss(ragged_out, sg, 1.25, num_cores=1, tile_lanes=128))
    assert jnp.allclose(l_two[0, 0], l_ref, rtol=1e-3, atol=1e-6), (l_two, l_ref)
    assert jnp.allclose(l_one[0, 0], l_ref, rtol=1e-3, atol=1e-6), (l_one, l_ref)

    print("KERNEL_OK")
</pallas_src>

<mosaic_0001>
module attributes {stable_mosaic.version = 11 : i64} {
  func.func @_partial_gram_kernel(%arg0: i32, %arg1: i32, %arg2: memref<8x256xf32, #tpu.memory_space<vmem>>, %arg3: memref<1x8x8xf32, #tpu.memory_space<vmem>>) attributes {dimension_semantics = [#tpu.dimension_semantics<parallel>, #tpu.dimension_semantics<arbitrary>], iteration_bounds = array<i64: 1, 1>, scalar_prefetch = 0 : i64, scratch_operands = 0 : i64, tpu.core_type = #tpu.core_type<tc>, window_params = [{transform_indices = @transform_0, window_bounds = array<i64: 8, 256>}, {transform_indices = @transform_1, window_bounds = array<i64: 1, 8, 8>}]} {
    %c0_i32 = arith.constant 0 : i32
    %0 = arith.cmpi eq, %arg1, %c0_i32 : i32
    %1 = arith.extui %0 : i1 to i32
    %c0_i32_0 = arith.constant 0 : i32
    %2 = arith.cmpi ne, %1, %c0_i32_0 : i32
    scf.if %2 {
      %cst_10 = arith.constant 0.000000e+00 : f32
      %14 = vector.broadcast %cst_10 : f32 to vector<8x8xf32>
      %c0_11 = arith.constant 0 : index
      %c0_12 = arith.constant 0 : index
      %c0_13 = arith.constant 0 : index
      %15 = vector.load %arg3[%c0_11, %c0_12, %c0_13] : memref<1x8x8xf32, #tpu.memory_space<vmem>>, vector<1x8x8xf32>
      %16 = vector.shape_cast %15 : vector<1x8x8xf32> to vector<8x8xf32>
      %17 = vector.shape_cast %14 : vector<8x8xf32> to vector<1x8x8xf32>
      tpu.vector_store %arg3[%c0_11, %c0_12, %c0_13], %17 {strides = array<i32>} : memref<1x8x8xf32, #tpu.memory_space<vmem>>, vector<1x8x8xf32>,
    } else {
    }
    %c0 = arith.constant 0 : index
    %c0_1 = arith.constant 0 : index
    %3 = vector.load %arg2[%c0, %c0_1] : memref<8x256xf32, #tpu.memory_space<vmem>>, vector<8x256xf32>
    %c0_2 = arith.constant 0 : index
    %c0_3 = arith.constant 0 : index
    %c0_4 = arith.constant 0 : index
    %4 = vector.load %arg3[%c0_2, %c0_3, %c0_4] : memref<1x8x8xf32, #tpu.memory_space<vmem>>, vector<1x8x8xf32>
    %5 = vector.shape_cast %4 : vector<1x8x8xf32> to vector<8x8xf32>
    %cst = arith.constant dense<0.000000e+00> : vector<8x8xf32>
    %6 = tpu.matmul %3, %3, %cst {dimension_numbers = #tpu.dot_dimension_numbers<[1], [1], [0], [0], [0, 0, 1, 0], [], []>} : vector<8x256xf32>, vector<8x256xf32>, vector<8x8xf32> -> vector<8x8xf32>
    %7 = arith.addf %5, %6 : vector<8x8xf32>
    %c0_5 = arith.constant 0 : index
    %c0_6 = arith.constant 0 : index
    %c0_7 = arith.constant 0 : index
    %8 = vector.load %arg3[%c0_5, %c0_6, %c0_7] : memref<1x8x8xf32, #tpu.memory_space<vmem>>, vector<1x8x8xf32>
    %9 = vector.shape_cast %8 : vector<1x8x8xf32> to vector<8x8xf32>
    %10 = vector.shape_cast %7 : vector<8x8xf32> to vector<1x8x8xf32>
    tpu.vector_store %arg3[%c0_5, %c0_6, %c0_7], %10 {strides = array<i32>} : memref<1x8x8xf32, #tpu.memory_space<vmem>>, vector<1x8x8xf32>,
    %c0_i32_8 = arith.constant 0 : i32
    %11 = arith.cmpi eq, %arg1, %c0_i32_8 : i32
    %12 = arith.extui %11 : i1 to i32
    %c0_i32_9 = arith.constant 0 : i32
    %13 = arith.cmpi ne, %12, %c0_i32_9 : i32
    scf.if %13 {
      %c0_10 = arith.constant 0 : index
      %c0_11 = arith.constant 0 : index
      %c0_12 = arith.constant 0 : index
      %14 = vector.load %arg3[%c0_10, %c0_11, %c0_12] : memref<1x8x8xf32, #tpu.memory_space<vmem>>, vector<1x8x8xf32>
      %15 = vector.shape_cast %14 : vector<1x8x8xf32> to vector<8x8xf32>
      %cst_13 = arith.constant 4.8828125E-4 : f32
      %16 = vector.broadcast %cst_13 : f32 to vector<8x8xf32>
      %17 = arith.mulf %15, %16 : vector<8x8xf32>
      %c0_14 = arith.constant 0 : index
      %c0_15 = arith.constant 0 : index
      %c0_16 = arith.constant 0 : index
      %18 = vector.load %arg3[%c0_14, %c0_15, %c0_16] : memref<1x8x8xf32, #tpu.memory_space<vmem>>, vector<1x8x8xf32>
      %19 = vector.shape_cast %18 : vector<1x8x8xf32> to vector<8x8xf32>
      %20 = vector.shape_cast %17 : vector<8x8xf32> to vector<1x8x8xf32>
      tpu.vector_store %arg3[%c0_14, %c0_15, %c0_16], %20 {strides = array<i32>} : memref<1x8x8xf32, #tpu.memory_space<vmem>>, vector<1x8x8xf32>,
    } else {
    }
    return
  }
  func.func @transform_0(%arg0: i32, %arg1: i32) -> (i32, i32) {
    %c1_i32 = arith.constant 1 : i32
    %0 = arith.muli %arg0, %c1_i32 : i32
    %1 = arith.addi %0, %arg1 : i32
    %c0_i32 = arith.constant 0 : i32
    %c0_i32_0 = arith.constant 0 : i32
    return %c0_i32, %1 : i32, i32
  }
  func.func @transform_1(%arg0: i32, %arg1: i32) -> (i32, i32, i32) {
    %c0_i32 = arith.constant 0 : i32
    %c0_i32_0 = arith.constant 0 : i32
    %c0_i32_1 = arith.constant 0 : i32
    return %arg0, %c0_i32, %c0_i32_0 : i32, i32, i32
  }
}

</mosaic_0001>

<bundles_post_ra>
// kernel: tpu_custom_call.1
= control target key start
LH: loop header
LB: loop body
LE: loop exit
PB: predicated region body
PF: predicated region fallthrough
CT: control target
= control target key end

     0   :  { %6 = vsyncpa [#allocation3], 0  ;;  %s221_s0 = inlined_call_operand.hbm [shape: f32[8,256], index: 0, kind: input, shape index: {}]   ;;  %s222_s1 = inlined_call_operand.hbm [shape: f32[1,8,8], index: 1, kind: output, shape index: {}]  }
   0x1   :  { %7 = vsyncpa [#allocation4], 0  ;;  %s181_s6 = smov [#allocation2]   ;;  %s133_s10 = scalar_lea.hbm %s221_s0, 256 }
   0x2   :  { %s18_s7 = sshll.u32 %s181_s6, 4  ;;  %p134_p0 = scmp.ne.s32.totalorder %s221_s0, %s133_s10  ;;  %s19_s7 = int_to_ptr.vmem [resolvable:$true] %s18_s7 }
   0x3   :  { %p137_p1 = scmp.lt.u32.totalorder %s133_s10, %s221_s0 }
   0x5   :  { %p139_p2 = pnand %p137_p1, %p134_p0 }
   0x7   :  { %142 = shalt.err (!%p139_p2)
}
   0x8   :  { %s143_s15 = scalar_lea.vmem %s19_s7, 256  ;;  %p148_p4 = scmp.lt.s32.totalorder %s19_s7, %s19_s7 }
   0x9   :  { %p144_p3 = scmp.ne.s32.totalorder %s19_s7, %s143_s15  ;;  %p149_p5 = scmp.lt.s32.totalorder %s143_s15, %s143_s15 }
   0xb   :  { %p150_p6 = por %p149_p5, %p148_p4 }
   0xd   :  { %p151_p7 = pnand %p150_p6, %p144_p3 }
   0xf   :  { %154 = shalt.err (!%p151_p7)
}
  0x10   :  { %21 = dma.hbm_to_vmem [thread:$0]  %s221_s0, 256, %s19_s7, [#allocation3]  }
  0x11   :  { %177 = dma.done.wait [#allocation3], 256  }
  0x12   :  { %178 = vsyncadd [#allocation3], 4294967040  ;;  %vm31_vm0 = vcmask 64512   ;;  %v182_v0 = vmov 0.0   ;;  %v34_v1 = vld [vmem:[#allocation2 + $0x8] sm:$0xff]  ;;  %v33_v2 = vld [vmem:[#allocation2] sm:$0xff] }
  0x13   :  { %32 = vst.msk [vmem:[#allocation5] sm:$0xff] %vm31_vm0, %v182_v0  ;;  %36 = vmatprep.subr.mxu0 %v34_v1  ;;  %100 = vmatprep.mubr.f32.mxu0 %v34_v1  ;;  %s183_s18 = smov [#allocation5]  }
  0x14   :  { %37 = vmatpush1.xpose.msra.mxu0 %v33_v2  ;;  %s121_s0 = sshll.u32 %s183_s18, 4  ;;  %s122_s0 = int_to_ptr.vmem [resolvable:$true] %s121_s0 }
  0x15   :  { %s155_s19 = scalar_lea.vmem %s122_s0, 128  ;;  %p160_p9 = scmp.lt.s32.totalorder %s122_s0, %s122_s0 }
  0x16   :  { %p156_p8 = scmp.ne.s32.totalorder %s122_s0, %s155_s19  ;;  %p161_p10 = scmp.lt.s32.totalorder %s155_s19, %s155_s19 }
  0x17   :  { %101 = vmatmul.mubr.f32.vlgmr.msra.gmra.mrb[0].mxu0 %v33_v2 }
  0x18   :  { %p162_p11 = por %p161_p10, %p160_p9 }
  0x1a   :  { %v35_v3 = vld [vmem:[#allocation5] sm:$0xff]  ;;  %p163_p12 = pnand %p162_p11, %p156_p8 }
  0xea   :  { %v102_v4 = vpop.f32.mrb[0].mxu0 }
  0xeb   :  { %v106_v5 = vadd.f32 %v102_v4, %v35_v3  ;;  %v104_v6 = vpop.f32.mrb[1].mxu0 }
  0xed   :  { %108 = vst.msk [vmem:[#allocation5] sm:$0xff] %vm31_vm0, %v106_v5 }
  0xf4   :  { %v112_v7 = vld [vmem:[#allocation5] sm:$0xff] }
  0xf5   :  { %v113_v8 = vmul.f32 0.00048828125, %v112_v7 }
  0xf7   :  { %114 = vst.msk [vmem:[#allocation5] sm:$0xff] %vm31_vm0, %v113_v8 }
  0xf8   :  { %166 = shalt.err (!%p163_p12)
}
  0xf9   :  { %s167_s22 = scalar_lea.hbm %s222_s1, 128 }
  0xfa   :  { %p168_p13 = scmp.ne.s32.totalorder %s222_s1, %s167_s22  ;;  %p171_p0 = scmp.lt.u32.totalorder %s167_s22, %s222_s1 }
  0xfc   :  { %p173_p1 = pnand %p171_p0, %p168_p13 }
  0xfe   :  { %176 = shalt.err (!%p173_p1)
}
  0xff   :  { %124 = dma.vmem_to_hbm [thread:$0]  %s122_s0, 128, %s222_s1, [#allocation4]  }
 0x100   :  { %179 = dma.done.wait [#allocation4], 128  }
 0x101   :  { %180 = vsyncadd [#allocation4], 4294967168 }
 0x102   :  { %128 = vsyncpa [#allocation3], 1 }
 0x103   :  { %129 = vsyncpa [#allocation4], 1 }

</bundles_post_ra>
